<compile_context>
chip_gen: v7x
topology: tpu7x:2x2x1
jax: 0.10.0
libtpu: 0.0.40
codegen_flags: <defaults>
</compile_context>

<pallas_src>
import functools

import jax
import jax.numpy as jnp
from jax.experimental import pallas as pl
from jax.experimental.pallas import tpu as pltpu

HIDDEN = 32            # GCLSTM out_channels
GATES = 4 * HIDDEN     # i, f, c~, o stacked along the lane axis -> 128 lanes


def _round_up(a, m):
    return ((a + m - 1) // m) * m


def _gclstm_kernel(x_ref, h_ref, c_ref, wx_ref, wu_ref, b_ref, p_ref, wl_ref,
                   bl_ref, h0_ref, c0_ref, y_ref, *, matmul_dtype):
    """One row-tile of nodes: fused gate matmuls + LSTM elementwise + linear head.

    x_ref : [tile_n, f_in]      node features (caller's storage dtype)
    h_ref : [tile_n, HIDDEN]    previous hidden state (caller's storage dtype)
    c_ref : [tile_n, HIDDEN]    previous cell state
    wx_ref: [f_in, 4*HIDDEN]    stacked x-path weights W_g
    wu_ref: [HIDDEN, 4*HIDDEN]  stacked ChebConv Theta_0 weights per gate
    b_ref : [1, 4*HIDDEN]       folded (ChebConv bias + gate bias), f32
    p_ref : [1, 4*HIDDEN]       peephole row [w_ci | w_cf | 0 | w_co], f32
    wl_ref: [1, HIDDEN]         linear-head weight row, f32
    bl_ref: [1, 1] (SMEM)       linear-head bias scalar
    h0_ref: [tile_n, HIDDEN]    new hidden state (f32)
    c0_ref: [tile_n, HIDDEN]    new cell state (f32)
    y_ref : [tile_n, 1]         head output (f32)
    """
    # MXU operands cast on the VPU (free under the input DMA); f32 accumulation.
    x = x_ref[...].astype(matmul_dtype)
    h = h_ref[...].astype(matmul_dtype)
    wx = wx_ref[...].astype(matmul_dtype)
    wu = wu_ref[...].astype(matmul_dtype)

    gates = (jnp.dot(x, wx, preferred_element_type=jnp.float32)
             + jnp.dot(h, wu, preferred_element_type=jnp.float32)
             + b_ref[...])                       # f32 bias row added on the VPU

    c_old = c_ref[...].astype(jnp.float32)
    peep = p_ref[...]                            # [1, 128] f32

    i_g = jax.nn.sigmoid(gates[:, 0 * HIDDEN:1 * HIDDEN]
                         + peep[:, 0 * HIDDEN:1 * HIDDEN] * c_old)
    f_g = jax.nn.sigmoid(gates[:, 1 * HIDDEN:2 * HIDDEN]
                         + peep[:, 1 * HIDDEN:2 * HIDDEN] * c_old)
    t_g = jnp.tanh(gates[:, 2 * HIDDEN:3 * HIDDEN])
    c_new = f_g * c_old + i_g * t_g
    o_g = jax.nn.sigmoid(gates[:, 3 * HIDDEN:4 * HIDDEN]
                         + peep[:, 3 * HIDDEN:4 * HIDDEN] * c_new)
    h_new = o_g * jnp.tanh(c_new)

    # Linear(32, 1) head on the VPU + XLU (an N=1 MXU matmul would waste the
    # array and serialize through the result FIFO).
    y = (jnp.sum(jnp.maximum(h_new, 0.0) * wl_ref[...], axis=-1, keepdims=True)
         + bl_ref[0, 0])

    h0_ref[...] = h_new.astype(h0_ref.dtype)
    c0_ref[...] = c_new.astype(c0_ref.dtype)
    y_ref[...] = y.astype(y_ref.dtype)


@functools.partial(jax.jit, static_argnames=("tile_n", "matmul_dtype"))
def recurrent_gcn_gclstm(x, edge_index, edge_weight, h, c, params, *,
                         tile_n=1024, matmul_dtype=jnp.bfloat16):
    """Forward pass of RecurrentGCN_GCLSTM. Returns (y, h_0, c_0).

    edge_index / edge_weight are accepted for API parity; with K=1 the ChebConv
    reduces to a dense Theta_0 map, so graph structure does not affect outputs
    (exactly as in the reference module).

    matmul_dtype only controls the MXU operand dtype (bf16 default on every
    generation); accumulation and all gate / elementwise math stay float32.
    x / h are read in whatever dtype the caller stores them in — carry them in
    bf16 across timesteps to halve the dominant read stream on a mem-bound
    kernel (no wrapper-side convert pass is ever inserted).
    """
    del edge_index, edge_weight  # K=1 Chebyshev conv: graph structure unused.
    n, f_in = x.shape

    # Row-tile selection:
    #  * as large as tile_n (amortize ~0.35us/grid-step, large DMA blocks),
    #  * but clamped so big graphs get >= ~4 grid steps for v7x megacore
    #    sharding via dimension_semantics=("parallel",), never below 512 rows,
    #  * 16-row aligned (covers both f32 and bf16 sublane packing),
    #  * no full-array pad: grid = cdiv(n, tn); the ragged last block is masked.
    sub = 16
    n_ceil = _round_up(n, sub)
    tn = min(int(tile_n), n_ceil, max(512, _round_up(pl.cdiv(n, 4), sub)))
    tn = _round_up(max(tn, sub), sub)
    grid = (pl.cdiv(n, tn),)

    w_row = params["w_lin"].reshape(1, HIDDEN).astype(jnp.float32)
    b_lin = params["b_lin"].reshape(1, 1).astype(jnp.float32)

    # Scoped-VMEM estimate (lane-padded to 128, double-buffered). Only set an
    # explicit limit when tiles are pushed well past the defaults (v5e: 16 MiB).
    est_vmem = 2 * tn * 128 * (x.dtype.itemsize + h.dtype.itemsize + 4 * 4)
    vmem_limit = None if est_vmem <= 12 * 2**20 else int(min(2 * est_vmem, 64 * 2**20))

    kernel = functools.partial(_gclstm_kernel, matmul_dtype=matmul_dtype)

    h0, c0, y = pl.pallas_call(
        kernel,
        out_shape=(jax.ShapeDtypeStruct((n, HIDDEN), jnp.float32),
                   jax.ShapeDtypeStruct((n, HIDDEN), jnp.float32),
                   jax.ShapeDtypeStruct((n, 1), jnp.float32)),
        grid_spec=pltpu.PrefetchScalarGridSpec(
            num_scalar_prefetch=0,
            grid=grid,
            in_specs=[
                pl.BlockSpec((tn, f_in), lambda i: (i, 0)),           # x rows
                pl.BlockSpec((tn, HIDDEN), lambda i: (i, 0)),         # h rows
                pl.BlockSpec((tn, HIDDEN), lambda i: (i, 0)),         # c rows
                pl.BlockSpec((f_in, GATES), lambda i: (0, 0)),        # W_x stacked
                pl.BlockSpec((HIDDEN, GATES), lambda i: (0, 0)),      # Theta stacked
                pl.BlockSpec((1, GATES), lambda i: (0, 0)),           # bias row (f32)
                pl.BlockSpec((1, GATES), lambda i: (0, 0)),           # peephole row
                pl.BlockSpec((1, HIDDEN), lambda i: (0, 0)),          # head weight row
                pl.BlockSpec(memory_space=pltpu.MemorySpace.SMEM),    # head bias scalar
            ],
            out_specs=(
                pl.BlockSpec((tn, HIDDEN), lambda i: (i, 0)),         # h_0
                pl.BlockSpec((tn, HIDDEN), lambda i: (i, 0)),         # c_0
                pl.BlockSpec((tn, 1), lambda i: (i, 0)),              # y
            ),
        ),
        compiler_params=pltpu.CompilerParams(
            dimension_semantics=("parallel",),   # shard row-tiles over TCs (v7x)
            vmem_limit_bytes=vmem_limit),
    )(x, h, c, params["w_x"], params["w_h"], params["b"], params["w_peep"],
      w_row, b_lin)

    return y, h0, c0


def init_params(key, node_features):
    """Deterministic synthetic parameters (shapes / init match the torch module)."""
    ks = jax.random.split(key, 13)
    glorot = jax.nn.initializers.glorot_uniform()
    # Gate order along the 128-lane axis: I, F, C(tilde), O.
    w_x = jnp.concatenate(
        [glorot(ks[i], (node_features, HIDDEN), jnp.float32) for i in range(4)],
        axis=1)                                           # x-path W_g
    w_h = jnp.concatenate(
        [glorot(ks[4 + i], (HIDDEN, HIDDEN), jnp.float32) for i in range(4)],
        axis=1)                                           # ChebConv Theta_0 per gate
    # Peephole rows (glorot in the reference). The cell-candidate gate has no
    # peephole; its 32-lane slot is zero so the row stays a single [1,128] tile.
    w_peep = jnp.concatenate(
        [glorot(ks[8], (1, HIDDEN), jnp.float32),
         glorot(ks[9], (1, HIDDEN), jnp.float32),
         jnp.zeros((1, HIDDEN), jnp.float32),
         glorot(ks[10], (1, HIDDEN), jnp.float32)], axis=1)
    # ChebConv bias + gate bias b_g (both zero-init in the reference), folded.
    b = jnp.zeros((1, GATES), jnp.float32)
    # torch.nn.Linear(32, 1): uniform(-1/sqrt(32), 1/sqrt(32)) for weight & bias.
    bound = 1.0 / float(HIDDEN) ** 0.5
    w_lin = jax.random.uniform(ks[11], (HIDDEN, 1), jnp.float32, -bound, bound)
    b_lin = jax.random.uniform(ks[12], (1, 1), jnp.float32, -bound, bound)
    return dict(w_x=w_x, w_h=w_h, b=b, w_peep=w_peep, w_lin=w_lin, b_lin=b_lin)


def reference_forward(x, h, c, params):
    """Pure-JAX reference written directly from the GCLSTM equations (unfused)."""
    hp = jax.lax.Precision.HIGHEST
    gates = (jnp.dot(x, params["w_x"], precision=hp)
             + jnp.dot(h, params["w_h"], precision=hp)
             + params["b"])
    p = params["w_peep"]
    i_g = jax.nn.sigmoid(gates[:, 0 * HIDDEN:1 * HIDDEN] + p[:, 0 * HIDDEN:1 * HIDDEN] * c)
    f_g = jax.nn.sigmoid(gates[:, 1 * HIDDEN:2 * HIDDEN] + p[:, 1 * HIDDEN:2 * HIDDEN] * c)
    t_g = jnp.tanh(gates[:, 2 * HIDDEN:3 * HIDDEN])
    c0 = f_g * c + i_g * t_g
    o_g = jax.nn.sigmoid(gates[:, 3 * HIDDEN:4 * HIDDEN] + p[:, 3 * HIDDEN:4 * HIDDEN] * c0)
    h0 = o_g * jnp.tanh(c0)
    y = jnp.dot(jnp.maximum(h0, 0.0), params["w_lin"], precision=hp) + params["b_lin"]
    return y, h0, c0


def _check(got, ref, atol, name):
    assert got.shape == ref.shape, f"{name}: shape {got.shape} vs {ref.shape}"
    err = float(jnp.max(jnp.abs(got.astype(jnp.float32) - ref.astype(jnp.float32))))
    assert err <= atol, f"{name} mismatch: max abs err {err} > {atol}"


if __name__ == "__main__":
    key = jax.random.PRNGKey(0)
    (k_par, k_x1, k_h1, k_c1, k_ei, k_ew,
     k_x2, k_h2, k_c2, k_x3, k_h3, k_c3) = jax.random.split(key, 12)

    node_features = 4
    num_edges = 32
    params = init_params(k_par, node_features)

    edge_index = jax.random.randint(k_ei, (2, num_edges), 0, 16, jnp.int32)
    edge_weight = jax.random.uniform(k_ew, (num_edges,), jnp.float32)

    # ---- Case 1: small graph, defaults (bf16 MXU operands), single grid step. ----
    # atol covers bf16 rounding of the MXU operands; gate/elementwise math is f32.
    n1 = 16
    x1 = jax.random.normal(k_x1, (n1, node_features), jnp.float32)
    h1 = jax.random.normal(k_h1, (n1, HIDDEN), jnp.float32)
    c1 = jax.random.normal(k_c1, (n1, HIDDEN), jnp.float32)
    y1, h0_1, c0_1 = recurrent_gcn_gclstm(x1, edge_index, edge_weight, h1, c1, params)
    jax.block_until_ready((y1, h0_1, c0_1))
    assert y1.shape == (n1, 1) and h0_1.shape == (n1, HIDDEN) and c0_1.shape == (n1, HIDDEN)
    y1_r, h0_1_r, c0_1_r = reference_forward(x1, h1, c1, params)
    _check(h0_1, h0_1_r, 1e-1, "case1 h_0")
    _check(c0_1, c0_1_r, 1e-1, "case1 c_0")
    _check(y1, y1_r, 1e-1, "case1 y")

    # ---- Case 2: f32 MXU path, n not a multiple of the tile -> ragged last block,
    # 4-step grid. In practice this agrees to ~1e-5; the looser bound only guards
    # against a precision-mode mismatch between the XLA reference dot and the
    # in-kernel Mosaic dot across compiler versions. ----
    n2 = 200
    x2 = jax.random.normal(k_x2, (n2, node_features), jnp.float32)
    h2 = jax.random.normal(k_h2, (n2, HIDDEN), jnp.float32)
    c2 = jax.random.normal(k_c2, (n2, HIDDEN), jnp.float32)
    y2, h0_2, c0_2 = recurrent_gcn_gclstm(x2, edge_index, edge_weight, h2, c2, params,
                                          tile_n=64, matmul_dtype=jnp.float32)
    jax.block_until_ready((y2, h0_2, c0_2))
    assert y2.shape == (n2, 1) and h0_2.shape == (n2, HIDDEN) and c0_2.shape == (n2, HIDDEN)
    y2_r, h0_2_r, c0_2_r = reference_forward(x2, h2, c2, params)
    _check(h0_2, h0_2_r, 5e-2, "case2 h_0")
    _check(c0_2, c0_2_r, 5e-2, "case2 c_0")
    _check(y2, y2_r, 5e-2, "case2 y")

    # ---- Case 3: larger graph with x / h already stored in bf16 (the halved-read-
    # stream rollout path), default tile -> 2 grid steps with a ragged tail. ----
    n3 = 1000
    x3 = jax.random.normal(k_x3, (n3, node_features), jnp.bfloat16)
    h3 = jax.random.normal(k_h3, (n3, HIDDEN), jnp.bfloat16)
    c3 = jax.random.normal(k_c3, (n3, HIDDEN), jnp.float32)
    y3, h0_3, c0_3 = recurrent_gcn_gclstm(x3, edge_index, edge_weight, h3, c3, params)
    jax.block_until_ready((y3, h0_3, c0_3))
    assert y3.shape == (n3, 1) and h0_3.shape == (n3, HIDDEN) and c0_3.shape == (n3, HIDDEN)
    y3_r, h0_3_r, c0_3_r = reference_forward(x3.astype(jnp.float32),
                                             h3.astype(jnp.float32), c3, params)
    _check(h0_3, h0_3_r, 1e-1, "case3 h_0")
    _check(c0_3, c0_3_r, 1e-1, "case3 c_0")
    _check(y3, y3_r, 1e-1, "case3 y")

    print("KERNEL_OK")
</pallas_src>

<mosaic_0001>
module attributes {stable_mosaic.version = 11 : i64} {
  func.func @_gclstm_kernel(%arg0: i32, %arg1: memref<16x4xf32, #tpu.memory_space<vmem>>, %arg2: memref<16x32xf32, #tpu.memory_space<vmem>>, %arg3: memref<16x32xf32, #tpu.memory_space<vmem>>, %arg4: memref<4x128xf32, #tpu.memory_space<vmem>>, %arg5: memref<32x128xf32, #tpu.memory_space<vmem>>, %arg6: memref<1x128xf32, #tpu.memory_space<vmem>>, %arg7: memref<1x128xf32, #tpu.memory_space<vmem>>, %arg8: memref<1x32xf32, #tpu.memory_space<vmem>>, %arg9: memref<1x1xf32, #tpu.memory_space<smem>>, %arg10: memref<16x32xf32, #tpu.memory_space<vmem>>, %arg11: memref<16x32xf32, #tpu.memory_space<vmem>>, %arg12: memref<16x1xf32, #tpu.memory_space<vmem>>) attributes {dimension_semantics = [#tpu.dimension_semantics<parallel>], iteration_bounds = array<i64: 1>, scalar_prefetch = 0 : i64, scratch_operands = 0 : i64, tpu.core_type = #tpu.core_type<tc>, window_params = [{transform_indices = @transform_0, window_bounds = array<i64: 16, 4>}, {transform_indices = @transform_1, window_bounds = array<i64: 16, 32>}, {transform_indices = @transform_2, window_bounds = array<i64: 16, 32>}, {pipeline_mode = #tpu.pipeline_mode<synchronous>, transform_indices = @transform_3, window_bounds = array<i64: 4, 128>}, {pipeline_mode = #tpu.pipeline_mode<synchronous>, transform_indices = @transform_4, window_bounds = array<i64: 32, 128>}, {pipeline_mode = #tpu.pipeline_mode<synchronous>, transform_indices = @transform_5, window_bounds = array<i64: 1, 128>}, {pipeline_mode = #tpu.pipeline_mode<synchronous>, transform_indices = @transform_6, window_bounds = array<i64: 1, 128>}, {pipeline_mode = #tpu.pipeline_mode<synchronous>, transform_indices = @transform_7, window_bounds = array<i64: 1, 32>}, {transform_indices = @transform_8, window_bounds = array<i64: 1, 1>}, {transform_indices = @transform_9, window_bounds = array<i64: 16, 32>}, {transform_indices = @transform_10, window_bounds = array<i64: 16, 32>}, {transform_indices = @transform_11, window_bounds = array<i64: 16, 1>}]} {
    %c0 = arith.constant 0 : index
    %c0_0 = arith.constant 0 : index
    %0 = vector.load %arg1[%c0, %c0_0] : memref<16x4xf32, #tpu.memory_space<vmem>>, vector<16x4xf32>
    %1 = arith.truncf %0 : vector<16x4xf32> to vector<16x4xbf16>
    %c0_1 = arith.constant 0 : index
    %c0_2 = arith.constant 0 : index
    %2 = vector.load %arg2[%c0_1, %c0_2] : memref<16x32xf32, #tpu.memory_space<vmem>>, vector<16x32xf32>
    %3 = arith.truncf %2 : vector<16x32xf32> to vector<16x32xbf16>
    %c0_3 = arith.constant 0 : index
    %c0_4 = arith.constant 0 : index
    %4 = vector.load %arg4[%c0_3, %c0_4] : memref<4x128xf32, #tpu.memory_space<vmem>>, vector<4x128xf32>
    %5 = arith.truncf %4 : vector<4x128xf32> to vector<4x128xbf16>
    %c0_5 = arith.constant 0 : index
    %c0_6 = arith.constant 0 : index
    %6 = vector.load %arg5[%c0_5, %c0_6] : memref<32x128xf32, #tpu.memory_space<vmem>>, vector<32x128xf32>
    %7 = arith.truncf %6 : vector<32x128xf32> to vector<32x128xbf16>
    %cst = arith.constant dense<0.000000e+00> : vector<16x128xf32>
    %8 = tpu.matmul %1, %5, %cst {dimension_numbers = #tpu.dot_dimension_numbers<[1], [0], [0], [1], [0, 0, 1, 1], [], []>} : vector<16x4xbf16>, vector<4x128xbf16>, vector<16x128xf32> -> vector<16x128xf32>
    %cst_7 = arith.constant dense<0.000000e+00> : vector<16x128xf32>
    %9 = tpu.matmul %3, %7, %cst_7 {dimension_numbers = #tpu.dot_dimension_numbers<[1], [0], [0], [1], [0, 0, 1, 1], [], []>} : vector<16x32xbf16>, vector<32x128xbf16>, vector<16x128xf32> -> vector<16x128xf32>
    %10 = arith.addf %8, %9 : vector<16x128xf32>
    %c0_8 = arith.constant 0 : index
    %c0_9 = arith.constant 0 : index
    %11 = vector.load %arg6[%c0_8, %c0_9] : memref<1x128xf32, #tpu.memory_space<vmem>>, vector<1x128xf32>
    %12 = vector.broadcast %11 : vector<1x128xf32> to vector<16x128xf32>
    %13 = arith.addf %10, %12 : vector<16x128xf32>
    %c0_10 = arith.constant 0 : index
    %c0_11 = arith.constant 0 : index
    %14 = vector.load %arg3[%c0_10, %c0_11] : memref<16x32xf32, #tpu.memory_space<vmem>>, vector<16x32xf32>
    %c0_12 = arith.constant 0 : index
    %c0_13 = arith.constant 0 : index
    %15 = vector.load %arg7[%c0_12, %c0_13] : memref<1x128xf32, #tpu.memory_space<vmem>>, vector<1x128xf32>
    %16 = vector.extract_strided_slice %13 {offsets = [0, 0], sizes = [16, 32], strides = [1, 1]} : vector<16x128xf32> to vector<16x32xf32>
    %17 = vector.extract_strided_slice %15 {offsets = [0, 0], sizes = [1, 32], strides = [1, 1]} : vector<1x128xf32> to vector<1x32xf32>
    %18 = vector.broadcast %17 : vector<1x32xf32> to vector<16x32xf32>
    %19 = arith.mulf %18, %14 : vector<16x32xf32>
    %20 = arith.addf %16, %19 : vector<16x32xf32>
    %21 = arith.negf %20 : vector<16x32xf32>
    %22 = math.exp %21 : vector<16x32xf32>
    %cst_14 = arith.constant 1.000000e+00 : f32
    %23 = vector.broadcast %cst_14 : f32 to vector<16x32xf32>
    %24 = arith.addf %23, %22 : vector<16x32xf32>
    %25 = arith.divf %23, %24 : vector<16x32xf32>
    %26 = vector.extract_strided_slice %13 {offsets = [0, 32], sizes = [16, 32], strides = [1, 1]} : vector<16x128xf32> to vector<16x32xf32>
    %27 = vector.extract_strided_slice %15 {offsets = [0, 32], sizes = [1, 32], strides = [1, 1]} : vector<1x128xf32> to vector<1x32xf32>
    %28 = vector.broadcast %27 : vector<1x32xf32> to vector<16x32xf32>
    %29 = arith.mulf %28, %14 : vector<16x32xf32>
    %30 = arith.addf %26, %29 : vector<16x32xf32>
    %31 = arith.negf %30 : vector<16x32xf32>
    %32 = math.exp %31 : vector<16x32xf32>
    %cst_15 = arith.constant 1.000000e+00 : f32
    %33 = vector.broadcast %cst_15 : f32 to vector<16x32xf32>
    %34 = arith.addf %33, %32 : vector<16x32xf32>
    %35 = arith.divf %33, %34 : vector<16x32xf32>
    %36 = vector.extract_strided_slice %13 {offsets = [0, 64], sizes = [16, 32], strides = [1, 1]} : vector<16x128xf32> to vector<16x32xf32>
    %37 = math.tanh %36 : vector<16x32xf32>
    %38 = arith.mulf %35, %14 : vector<16x32xf32>
    %39 = arith.mulf %25, %37 : vector<16x32xf32>
    %40 = arith.addf %38, %39 : vector<16x32xf32>
    %41 = vector.extract_strided_slice %13 {offsets = [0, 96], sizes = [16, 32], strides = [1, 1]} : vector<16x128xf32> to vector<16x32xf32>
    %42 = vector.extract_strided_slice %15 {offsets = [0, 96], sizes = [1, 32], strides = [1, 1]} : vector<1x128xf32> to vector<1x32xf32>
    %43 = vector.broadcast %42 : vector<1x32xf32> to vector<16x32xf32>
    %44 = arith.mulf %43, %40 : vector<16x32xf32>
    %45 = arith.addf %41, %44 : vector<16x32xf32>
    %46 = arith.negf %45 : vector<16x32xf32>
    %47 = math.exp %46 : vector<16x32xf32>
    %cst_16 = arith.constant 1.000000e+00 : f32
    %48 = vector.broadcast %cst_16 : f32 to vector<16x32xf32>
    %49 = arith.addf %48, %47 : vector<16x32xf32>
    %50 = arith.divf %48, %49 : vector<16x32xf32>
    %51 = math.tanh %40 : vector<16x32xf32>
    %52 = arith.mulf %50, %51 : vector<16x32xf32>
    %cst_17 = arith.constant 0.000000e+00 : f32
    %53 = vector.broadcast %cst_17 : f32 to vector<16x32xf32>
    %54 = arith.maximumf %52, %53 : vector<16x32xf32>
    %c0_18 = arith.constant 0 : index
    %c0_19 = arith.constant 0 : index
    %55 = vector.load %arg8[%c0_18, %c0_19] : memref<1x32xf32, #tpu.memory_space<vmem>>, vector<1x32xf32>
    %56 = vector.broadcast %55 : vector<1x32xf32> to vector<16x32xf32>
    %57 = arith.mulf %54, %56 : vector<16x32xf32>
    %cst_20 = arith.constant dense<0.000000e+00> : vector<16xf32>
    %58 = vector.multi_reduction <add>, %57, %cst_20 [1] : vector<16x32xf32> to vector<16xf32>
    %59 = vector.shape_cast %58 : vector<16xf32> to vector<16x1xf32>
    %c0_21 = arith.constant 0 : index
    %c0_22 = arith.constant 0 : index
    %60 = memref.load %arg9[%c0_21, %c0_22] : memref<1x1xf32, #tpu.memory_space<smem>>
    %61 = vector.broadcast %60 : f32 to vector<16x1xf32>
    %62 = arith.addf %59, %61 : vector<16x1xf32>
    %c0_23 = arith.constant 0 : index
    %c0_24 = arith.constant 0 : index
    %63 = vector.load %arg10[%c0_23, %c0_24] : memref<16x32xf32, #tpu.memory_space<vmem>>, vector<16x32xf32>
    tpu.vector_store %arg10[%c0_23, %c0_24], %52 {strides = array<i32>} : memref<16x32xf32, #tpu.memory_space<vmem>>, vector<16x32xf32>,
    %c0_25 = arith.constant 0 : index
    %c0_26 = arith.constant 0 : index
    %64 = vector.load %arg11[%c0_25, %c0_26] : memref<16x32xf32, #tpu.memory_space<vmem>>, vector<16x32xf32>
    tpu.vector_store %arg11[%c0_25, %c0_26], %40 {strides = array<i32>} : memref<16x32xf32, #tpu.memory_space<vmem>>, vector<16x32xf32>,
    %c0_27 = arith.constant 0 : index
    %c0_28 = arith.constant 0 : index
    %65 = vector.load %arg12[%c0_27, %c0_28] : memref<16x1xf32, #tpu.memory_space<vmem>>, vector<16x1xf32>
    tpu.vector_store %arg12[%c0_27, %c0_28], %62 {strides = array<i32>} : memref<16x1xf32, #tpu.memory_space<vmem>>, vector<16x1xf32>,
    return
  }
  func.func @transform_0(%arg0: i32) -> (i32, i32) {
    %c0_i32 = arith.constant 0 : i32
    %c0_i32_0 = arith.constant 0 : i32
    return %arg0, %c0_i32 : i32, i32
  }
  func.func @transform_1(%arg0: i32) -> (i32, i32) {
    %c0_i32 = arith.constant 0 : i32
    %c0_i32_0 = arith.constant 0 : i32
    return %arg0, %c0_i32 : i32, i32
  }
  func.func @transform_2(%arg0: i32) -> (i32, i32) {
    %c0_i32 = arith.constant 0 : i32
    %c0_i32_0 = arith.constant 0 : i32
    return %arg0, %c0_i32 : i32, i32
  }
  func.func @transform_3(%arg0: i32) -> (i32, i32) {
    %c0_i32 = arith.constant 0 : i32
    %c0_i32_0 = arith.constant 0 : i32
    %c0_i32_1 = arith.constant 0 : i32
    return %c0_i32, %c0_i32_0 : i32, i32
  }
  func.func @transform_4(%arg0: i32) -> (i32, i32) {
    %c0_i32 = arith.constant 0 : i32
    %c0_i32_0 = arith.constant 0 : i32
    %c0_i32_1 = arith.constant 0 : i32
    return %c0_i32, %c0_i32_0 : i32, i32
  }
  func.func @transform_5(%arg0: i32) -> (i32, i32) {
    %c0_i32 = arith.constant 0 : i32
    %c0_i32_0 = arith.constant 0 : i32
    %c0_i32_1 = arith.constant 0 : i32
    return %c0_i32, %c0_i32_0 : i32, i32
  }
  func.func @transform_6(%arg0: i32) -> (i32, i32) {
    %c0_i32 = arith.constant 0 : i32
    %c0_i32_0 = arith.constant 0 : i32
    %c0_i32_1 = arith.constant 0 : i32
    return %c0_i32, %c0_i32_0 : i32, i32
  }
  func.func @transform_7(%arg0: i32) -> (i32, i32) {
    %c0_i32 = arith.constant 0 : i32
    %c0_i32_0 = arith.constant 0 : i32
    %c0_i32_1 = arith.constant 0 : i32
    return %c0_i32, %c0_i32_0 : i32, i32
  }
  func.func @transform_8(%arg0: i32) -> (i32, i32) {
    %c0_i32 = arith.constant 0 : i32
    %c0_i32_0 = arith.constant 0 : i32
    %c0_i32_1 = arith.constant 0 : i32
    return %c0_i32, %c0_i32_0 : i32, i32
  }
  func.func @transform_9(%arg0: i32) -> (i32, i32) {
    %c0_i32 = arith.constant 0 : i32
    %c0_i32_0 = arith.constant 0 : i32
    return %arg0, %c0_i32 : i32, i32
  }
  func.func @transform_10(%arg0: i32) -> (i32, i32) {
    %c0_i32 = arith.constant 0 : i32
    %c0_i32_0 = arith.constant 0 : i32
    return %arg0, %c0_i32 : i32, i32
  }
  func.func @transform_11(%arg0: i32) -> (i32, i32) {
    %c0_i32 = arith.constant 0 : i32
    %c0_i32_0 = arith.constant 0 : i32
    return %arg0, %c0_i32 : i32, i32
  }
}

</mosaic_0001>

<bundles_post_ra>
// kernel: recurrent_gcn_gclstm.1
= control target key start
LH: loop header
LB: loop body
LE: loop exit
PB: predicated region body
PF: predicated region fallthrough
CT: control target
= control target key end

     0   :  { %18 = vsyncpa [#allocation4], 0  ;;  %s771_s0 = inlined_call_operand.vmem [shape: f32[16,4], index: 0, kind: input, shape index: {}]   ;;  %s772_s1 = inlined_call_operand.hbm [shape: f32[16,32], index: 1, kind: input, shape index: {}]   ;;  %s773_s2 = inlined_call_operand.hbm [shape: f32[16,32], index: 2, kind: input, shape index: {}]   ;;  %s774_s3 = inlined_call_operand.vmem [shape: f32[4,128], index: 3, kind: input, shape index: {}]   ;;  %s775_s4 = inlined_call_operand.vmem [shape: f32[32,128], index: 4, kind: input, shape index: {}]   ;;  %s776_s5 = inlined_call_operand.vmem [shape: f32[1,128], index: 5, kind: input, shape index: {}]   ;;  %s777_s6 = inlined_call_operand.vmem [shape: f32[1,128], index: 6, kind: input, shape index: {}]   ;;  %s778_s7 = inlined_call_operand.vmem [shape: f32[1,32], index: 7, kind: input, shape index: {}]   ;;  %s779_s8 = inlined_call_operand.<no memory space> [shape: f32[1,1], index: 8, kind: input, shape index: {}]   ;;  %s780_s9 = inlined_call_operand.hbm [shape: f32[16,32], index: 9, kind: output, shape index: {0}]   ;;  %s781_s10 = inlined_call_operand.hbm [shape: f32[16,32], index: 10, kind: output, shape index: {1}]   ;;  %s782_s11 = inlined_call_operand.vmem [shape: f32[16,1], index: 11, kind: output, shape index: {2}]  }
   0x1   :  { %19 = vsyncpa [#allocation7], 0 }
   0x2   :  { %20 = vsyncpa [#allocation5], 0 }
   0x3   :  { %21 = vsyncpa [#allocation10], 0  ;;  %s552_s17 = smov [#allocation3]   ;;  %s456_s21 = scalar_lea.hbm %s772_s1, 256 }
   0x4   :  { %s29_s18 = sshll.u32 %s552_s17, 4  ;;  %p457_p0 = scmp.ne.s32.totalorder %s772_s1, %s456_s21  ;;  %s30_s18 = int_to_ptr.vmem [resolvable:$true] %s29_s18 }
   0x5   :  { %p460_p1 = scmp.lt.u32.totalorder %s456_s21, %s772_s1 }
   0x7   :  { %p462_p2 = pnand %p460_p1, %p457_p0 }
   0x9   :  { %465 = shalt.err (!%p462_p2)
}
   0xa   :  { %s466_s26 = scalar_lea.vmem %s30_s18, 256  ;;  %p471_p4 = scmp.lt.s32.totalorder %s30_s18, %s30_s18 }
   0xb   :  { %p467_p3 = scmp.ne.s32.totalorder %s30_s18, %s466_s26  ;;  %p472_p5 = scmp.lt.s32.totalorder %s466_s26, %s466_s26 }
   0xd   :  { %p473_p6 = por %p472_p5, %p471_p4 }
   0xf   :  { %p474_p7 = pnand %p473_p6, %p467_p3 }
  0x11   :  { %477 = shalt.err (!%p474_p7)
}
  0x12   :  { %s553_s27 = smov 128   ;;  %s554_s28 = smov 8  }
  0x13   :  { %35 = dma.hbm_to_vmem [thread:$0]  %s772_s1, 256, %s30_s18, [#allocation4], %s553_s27, %s553_s27, %s554_s28  }
  0x14   :  { %s555_s12 = smov [#allocation6]   ;;  %s478_s16 = scalar_lea.hbm %s773_s2, 256 }
  0x15   :  { %s41_s13 = sshll.u32 %s555_s12, 4  ;;  %p479_p8 = scmp.ne.s32.totalorder %s773_s2, %s478_s16  ;;  %s42_s13 = int_to_ptr.vmem [resolvable:$true] %s41_s13 }
  0x16   :  { %p482_p9 = scmp.lt.u32.totalorder %s478_s16, %s773_s2 }
  0x18   :  { %p484_p10 = pnand %p482_p9, %p479_p8 }
  0x1a   :  { %487 = shalt.err (!%p484_p10)
}
  0x1b   :  { %s488_s22 = scalar_lea.vmem %s42_s13, 256  ;;  %p493_p12 = scmp.lt.s32.totalorder %s42_s13, %s42_s13 }
  0x1c   :  { %p489_p11 = scmp.ne.s32.totalorder %s42_s13, %s488_s22  ;;  %p494_p13 = scmp.lt.s32.totalorder %s488_s22, %s488_s22 }
  0x1e   :  { %p495_p0 = por %p494_p13, %p493_p12 }
  0x20   :  { %p496_p1 = pnand %p495_p0, %p489_p11 }
  0x22   :  { %499 = shalt.err (!%p496_p1)
}
  0x23   :  { %47 = dma.hbm_to_vmem [thread:$0]  %s773_s2, 256, %s42_s13, [#allocation7], %s553_s27, %s553_s27, %s554_s28  }
  0x24   :  { %544 = dma.done.wait [#allocation4], 256  }
  0x25   :  { %545 = vsyncadd [#allocation4], 4294967040 }
  0x26   :  { %546 = dma.done.wait [#allocation7], 256  }
  0x27   :  { %547 = vsyncadd [#allocation7], 4294967040  ;;  %v556_v0 = vmov 0.0   ;;  %vm557_vm0 = vmmov 0   ;;  %v75_v1 = vld [vmem:[%s775_s4] sm:$0xff]  ;;  %v76_v2 = vld [vmem:[%s775_s4 + $0x8] sm:$0xff] }
  0x28   :  { %399 = vmatprep.subr.bf16.mxu0 %v556_v0  ;;  %407 = vmatprep.subr.bf16.mxu1 %v556_v0  ;;  %v73_v3 = vld [vmem:[%s774_s3] sm:$0xf]  ;;  %vm130_vm1 = vcmask 1041408   ;;  %v79_v4 = vpack.c.bf16 %v76_v2, %v75_v1  ;;  %v77_v6 = vld [vmem:[%s775_s4 + $0x10] sm:$0xff]  ;;  %v78_v7 = vld [vmem:[%s775_s4 + $0x18] sm:$0xff]  ;;  %vm126_vm2 = vcmask 31744  }
  0x29   :  { %409 = vmatprep.mubr.msk.bf16.mxu1 %vm557_vm0, %v556_v0  ;;  %403 = vmatprep.mubr.msk.bf16.mxu0 %vm557_vm0, %v556_v0  ;;  %v74_v5 = vpack.c.bf16 %v73_v3, %v73_v3  ;;  %v67_v8 = vld [vmem:[%s771_s0] sm:$0xff]  ;;  %v68_v9 = vld [vmem:[%s771_s0 + $0x8] sm:$0xff]  ;;  %v80_v11 = vpack.c.bf16 %v78_v7, %v77_v6  ;;  %v184_v15 = vld [vmem:[#allocation6] sm:$0xff]  ;;  %s558_s3 = smov 32   ;;  %vm81_vm3 = vcmask 261120   ;;  %s559_s20 = smov 64  }
  0x2a   :  { %400 = vmatpush3.bf16.msra.mxu0 %v79_v4  ;;  %v69_v12 = vpack.c.bf16 %v68_v9, %v67_v8  ;;  %v70_v13 = vld [vmem:[#allocation3] sm:$0xff]  ;;  %v71_v14 = vld [vmem:[#allocation3 + $0x8] sm:$0xff]  ;;  %211 = vrot.lane.b32.xlu1 %v184_v15, %s558_s3  ;;  %v185_v17 = vld [vmem:[#allocation6 + $0x8] sm:$0xff]  ;;  %s560_s1 = smov 96  }
  0x2b   :  { %v132_v10 = vsel %vm130_vm1, %v74_v5, 0  ;;  %401 = vmatprep.subr.bf16.mxu0 %v556_v0  ;;  %v72_v16 = vpack.c.bf16 %v71_v14, %v70_v13  ;;  %v385_v22 = vld [vmem:[%s776_s5] ss:$0 sm:$0xff] }
  0x2c   :  { %408 = vmatpush3.bf16.msra.mxu1 %v132_v10  ;;  %v691_v33 = vld [vmem:[%s777_s6] ss:$0 sm:$0xff] }
  0x2d   :  { %v193_v34 = vmul.f32 %v691_v33, %v184_v15  ;;  %v194_v35 = vmul.f32 %v691_v33, %v185_v17  ;;  %v393_v7 = vld [vmem:[%s778_s7] ss:$0 sm:$0xff]  ;;  %s561_s7 = smov [#allocation8]  }
  0x2e   :  { %402 = vmatpush3.bf16.msra.mxu0 %v80_v11  ;;  %213 = vrot.lane.b32.xlu1 %v185_v17, %s558_s3  ;;  %s350_s18 = sshll.u32 %s561_s7, 4  ;;  %s351_s18 = int_to_ptr.vmem [resolvable:$true] %s350_s18 }
  0x2f   :  { %410 = vmatmul.mubr.msk.bf16.vlgmr.msra.gmra.mrb[0].mxu1 %vm126_vm2, %v69_v12  ;;  %s500_s23 = scalar_lea.vmem %s351_s18, 256  ;;  %p505_p3 = scmp.lt.s32.totalorder %s351_s18, %s351_s18 }
  0x30   :  { %p501_p2 = scmp.ne.s32.totalorder %s351_s18, %s500_s23  ;;  %p506_p4 = scmp.lt.s32.totalorder %s500_s23, %s500_s23 }
  0x31   :  { %404 = vmatmul.mubr.msk.bf16.vlgmr.msra.gmra.mrb[0].mxu0 %vm81_vm3, %v72_v16 }
  0x32   :  { %p507_p5 = por %p506_p4, %p505_p3 }
  0x34   :  { %p508_p6 = pnand %p507_p5, %p501_p2 }
  0x9c   :  { %v212_v50 = vpop.permute.xlu1 %211 }
  0x9d   :  { %v217_v51 = vmul.f32 %v691_v33, %v212_v50 }
  0xa0   :  { %v214_v52 = vpop.permute.xlu1 %213 }
  0xa1   :  { %v218_v54 = vmul.f32 %v691_v33, %v214_v52 }
 0x102   :  { %v168_v18 = vpop.f32.mrb[0].mxu1 }
 0x103   :  { %v411_v19 = vpop.f32.mrb[1].mxu1 }
 0x104   :  { %v171_v20 = vpop.f32.mrb[2].mxu1  ;;  %v119_v21 = vpop.f32.mrb[0].mxu0 }
 0x105   :  { %v412_v23 = vpop.f32.mrb[3].mxu1  ;;  %v169_v24 = vadd.f32 %v168_v18, %v119_v21  ;;  %v405_v25 = vpop.f32.mrb[1].mxu0 }
 0x106   :  { %v122_v26 = vpop.f32.mrb[2].mxu0 }
 0x107   :  { %v680_v27 = vadd.f32 %v385_v22, %v169_v24  ;;  %v172_v28 = vadd.f32 %v171_v20, %v122_v26  ;;  %v406_v29 = vpop.f32.mrb[3].mxu0 }
 0x109   :  { %v682_v30 = vadd.f32 %v385_v22, %v172_v28  ;;  %424 = vtanh.f32 %v680_v27  ;;  %v195_v36 = vadd.f32 %v193_v34, %v680_v27  ;;  %v219_v53 = vadd.f32 %v217_v51, %v680_v27 }
 0x10b   :  { %426 = vtanh.f32 %v682_v30  ;;  %v387_v37 = vmul.f32 -1.442695, %v195_v36  ;;  %v196_v38 = vadd.f32 %v194_v35, %v682_v30  ;;  %v389_v55 = vmul.f32 -1.442695, %v219_v53 }
 0x10c   :  { %v220_v56 = vadd.f32 %v218_v54, %v682_v30 }
 0x10d   :  { %428 = vpow2.f32 %v387_v37  ;;  %v388_v39 = vmul.f32 -1.442695, %v196_v38 }
 0x10e   :  { %v390_v57 = vmul.f32 -1.442695, %v220_v56 }
 0x10f   :  { %430 = vpow2.f32 %v388_v39 }
 0x113   :  { %v425_v31 = vpop.eup %424 }
 0x114   :  { %239 = vrot.lane.b32.xlu0 %v425_v31, %s559_s20 }
 0x115   :  { %v427_v32 = vpop.eup %426 }
 0x117   :  { %v429_v40 = vpop.eup %428 }
 0x118   :  { %241 = vrot.lane.b32.xlu0 %v427_v32, %s559_s20  ;;  %v203_v41 = vadd.f32 1.0, %v429_v40 }
 0x119   :  { %v431_v42 = vpop.eup %430 }
 0x11a   :  { %432 = vrcp.f32 %v203_v41  ;;  %v204_v43 = vadd.f32 1.0, %v431_v42 }
 0x11c   :  { %434 = vrcp.f32 %v204_v43 }
 0x11d   :  { %436 = vpow2.f32 %v389_v55 }
 0x11e   :  { %438 = vpow2.f32 %v390_v57 }
 0x124   :  { %v433_v44 = vpop.eup %432 }
 0x126   :  { %v435_v47 = vpop.eup %434 }
 0x127   :  { %v437_v58 = vpop.eup %436 }
 0x128   :  { %v227_v59 = vadd.f32 1.0, %v437_v58  ;;  %v439_v60 = vpop.eup %438 }
 0x129   :  { %v228_v61 = vadd.f32 1.0, %v439_v60 }
 0x12a   :  { %440 = vrcp.f32 %v227_v59 }
 0x12b   :  { %442 = vrcp.f32 %v228_v61 }
 0x134   :  { %v441_v62 = vpop.eup %440 }
 0x135   :  { %v235_v63 = vmul.f32 %v441_v62, %v212_v50  ;;  %v443_v0 = vpop.eup %442 }
 0x136   :  { %v236_v3 = vmul.f32 %v443_v0, %v214_v52 }
 0x186   :  { %v240_v45 = vpop.permute.xlu0 %239 }
 0x187   :  { %v245_v46 = vmul.f32 %v433_v44, %v240_v45 }
 0x189   :  { %249 = vrot.lane.b32.xlu0 %v245_v46, %s558_s3 }
 0x18a   :  { %v242_v48 = vpop.permute.xlu0 %241 }
 0x18b   :  { %v246_v49 = vmul.f32 %v435_v47, %v242_v48 }
 0x18d   :  { %251 = vrot.lane.b32.xlu1 %v246_v49, %s558_s3 }
 0x1fb   :  { %v250_v1 = vpop.permute.xlu0 %249 }
 0x1fc   :  { %v255_v2 = vadd.f32 %v250_v1, %v235_v63 }
 0x1fe   :  { %444 = vtanh.f32 %v255_v2  ;;  %259 = vrot.lane.b32.xlu0 %v255_v2, %s559_s20 }
 0x1ff   :  { %v252_v4 = vpop.permute.xlu1 %251 }
 0x200   :  { %v704_v5 = vadd.f32 %v252_v4, %v236_v3 }
 0x202   :  { %446 = vtanh.f32 %v704_v5  ;;  %261 = vrot.lane.b32.xlu1 %v704_v5, %s559_s20 }
 0x208   :  { %v445_v6 = vpop.eup %444 }
 0x209   :  { %285 = vrot.lane.b32.xlu0 %v445_v6, %s559_s20 }
 0x20c   :  { %v447_v8 = vpop.eup %446 }
 0x20d   :  { %287 = vrot.lane.b32.xlu1 %v447_v8, %s559_s20  ;;  %301 = vrot.lane.b32.xlu0 %v393_v7, %s560_s1 }
 0x270   :  { %v260_v9 = vpop.permute.xlu0 %259 }
 0x271   :  { %v265_v10 = vmul.f32 %v691_v33, %v260_v9 }
 0x273   :  { %v267_v11 = vadd.f32 %v265_v10, %v680_v27 }
 0x274   :  { %v262_v12 = vpop.permute.xlu1 %261 }
 0x275   :  { %v391_v13 = vmul.f32 -1.442695, %v267_v11  ;;  %v266_v14 = vmul.f32 %v691_v33, %v262_v12 }
 0x277   :  { %448 = vpow2.f32 %v391_v13  ;;  %v268_v15 = vadd.f32 %v266_v14, %v682_v30 }
 0x279   :  { %v392_v16 = vmul.f32 -1.442695, %v268_v15 }
 0x27b   :  { %450 = vpow2.f32 %v392_v16  ;;  %v286_v21 = vpop.permute.xlu0 %285 }
 0x27f   :  { %v302_v24 = vpop.permute.xlu0 %301  ;;  %v288_v27 = vpop.permute.xlu1 %287 }
 0x281   :  { %v449_v17 = vpop.eup %448 }
 0x282   :  { %v275_v18 = vadd.f32 1.0, %v449_v17 }
 0x284   :  { %452 = vrcp.f32 %v275_v18 }
 0x285   :  { %v451_v19 = vpop.eup %450 }
 0x286   :  { %v276_v20 = vadd.f32 1.0, %v451_v19 }
 0x288   :  { %454 = vrcp.f32 %v276_v20 }
 0x28e   :  { %v453_v22 = vpop.eup %452 }
 0x28f   :  { %v291_v23 = vmul.f32 %v453_v22, %v286_v21 }
 0x291   :  { %v293_v25 = vmax.f32 %v291_v23, 0.0 }
 0x292   :  { %v455_v26 = vpop.eup %454 }
 0x293   :  { %v292_v28 = vmul.f32 %v455_v26, %v288_v27  ;;  %v304_v29 = vmul.f32 %v302_v24, %v293_v25 }
 0x295   :  { %v294_v31 = vmax.f32 %v292_v28, 0.0  ;;  %308 = vrot.lane.b32.xlu1 %v304_v29, %s558_s3 }
 0x297   :  { %v305_v30 = vmul.f32 %v302_v24, %v294_v31 }
 0x299   :  { %328 = vrot.lane.b32.xlu1 %v292_v28, %s558_s3  ;;  %310 = vrot.lane.b32.xlu0 %v305_v30, %s558_s3 }
 0x29d   :  { %326 = vrot.lane.b32.xlu0 %v291_v23, %s558_s3 }
 0x307   :  { %v309_v32 = vpop.permute.xlu1 %308 }
 0x308   :  { %v314_v33 = vsel %vm81_vm3, %v309_v32, 0.0 }
 0x309   :  { %315 = vadd.xlane.f32.xlu1 %v314_v33 }
 0x30b   :  { %v311_v34 = vpop.permute.xlu0 %310  ;;  %v329_v35 = vpop.permute.xlu1 %328 }
 0x30c   :  { %333 = vst.msk [vmem:[#allocation8 + $0x8] sm:$0xff] %vm81_vm3, %v329_v35  ;;  %v317_v36 = vsel %vm81_vm3, %v311_v34, 0.0 }
 0x30d   :  { %318 = vadd.xlane.f32.xlu0 %v317_v36 }
 0x30f   :  { %v327_v37 = vpop.permute.xlu0 %326 }
 0x310   :  { %332 = vst.msk [vmem:[#allocation8] sm:$0xff] %vm81_vm3, %v327_v37 }
 0x31a   :  { %334 = vrot.lane.b32.xlu1 %v255_v2, %s560_s1 }
 0x31b   :  { %511 = shalt.err (!%p508_p6)
}
 0x31c   :  { %s512_s26 = scalar_lea.hbm %s780_s9, 256 }
 0x31d   :  { %p513_p7 = scmp.ne.s32.totalorder %s780_s9, %s512_s26  ;;  %p516_p8 = scmp.lt.u32.totalorder %s512_s26, %s780_s9 }
 0x31f   :  { %p518_p9 = pnand %p516_p8, %p513_p7 }
 0x321   :  { %521 = shalt.err (!%p518_p9)
}
 0x322   :  { %356 = dma.vmem_to_hbm [thread:$0]  %s351_s18, 256, %s780_s9, [#allocation5], %s553_s27, %s553_s27, %s554_s28   ;;  %vm342_vm4 = vcmask 7168  }
 0x323   :  { %336 = vrot.lane.b32.xlu0 %v704_v5, %s560_s1  ;;  %v321_v38 = vstv %s779_s8  ;;  %s562_s3 = smov [#allocation9]  }
 0x324   :  { %s362_s0 = sshll.u32 %s562_s3, 4  ;;  %s363_s0 = int_to_ptr.vmem [resolvable:$true] %s362_s0 }
 0x325   :  { %s522_s8 = scalar_lea.vmem %s363_s0, 256  ;;  %p527_p11 = scmp.lt.s32.totalorder %s363_s0, %s363_s0 }
 0x326   :  { %p523_p10 = scmp.ne.s32.totalorder %s363_s0, %s522_s8  ;;  %p528_p12 = scmp.lt.s32.totalorder %s522_s8, %s522_s8 }
 0x328   :  { %p529_p13 = por %p528_p12, %p527_p11 }
 0x32a   :  { %p530_p0 = pnand %p529_p13, %p523_p10 }
 0x396   :  { %v316_v39 = vpop.xlane.xlu1 %315 }
 0x397   :  { %v322_v40 = vadd.f32 %v321_v38, %v316_v39 }
 0x399   :  { %343 = vst.msk [vmem:[%s782_s11] sm:$0xff] %vm342_vm4, %v322_v40 }
 0x39a   :  { %v319_v41 = vpop.xlane.xlu0 %318  ;;  %v335_v42 = vpop.permute.xlu1 %334 }
 0x39b   :  { %v323_v43 = vadd.f32 %v321_v38, %v319_v41  ;;  %340 = vst.msk [vmem:[#allocation9] sm:$0xff] %vm81_vm3, %v335_v42 }
 0x39d   :  { %344 = vst.msk [vmem:[%s782_s11 + $0x8] sm:$0xff] %vm342_vm4, %v323_v43 }
 0x39e   :  { %v337_v44 = vpop.permute.xlu0 %336 }
 0x39f   :  { %341 = vst.msk [vmem:[#allocation9 + $0x8] sm:$0xff] %vm81_vm3, %v337_v44 }
 0x3a0   :  { %533 = shalt.err (!%p530_p0)
}
 0x3a1   :  { %s534_s21 = scalar_lea.hbm %s781_s10, 256 }
 0x3a2   :  { %p535_p1 = scmp.ne.s32.totalorder %s781_s10, %s534_s21  ;;  %p538_p2 = scmp.lt.u32.totalorder %s534_s21, %s781_s10 }
 0x3a4   :  { %p540_p3 = pnand %p538_p2, %p535_p1 }
 0x3a6   :  { %543 = shalt.err (!%p540_p3)
}
 0x3a7   :  { %368 = dma.vmem_to_hbm [thread:$0]  %s363_s0, 256, %s781_s10, [#allocation10], %s553_s27, %s553_s27, %s554_s28  }
 0x3a8   :  { %548 = dma.done.wait [#allocation5], 256  }
 0x3a9   :  { %549 = vsyncadd [#allocation5], 4294967040 }
 0x3aa   :  { %550 = dma.done.wait [#allocation10], 256  }
 0x3ab   :  { %551 = vsyncadd [#allocation10], 4294967040 }
 0x3ac   :  { %379 = vsyncpa [#allocation4], 1 }
 0x3ad   :  { %380 = vsyncpa [#allocation7], 1 }
 0x3ae   :  { %381 = vsyncpa [#allocation5], 1 }
 0x3af   :  { %382 = vsyncpa [#allocation10], 1 }

</bundles_post_ra>
